<compile_context>
chip_gen: v7x
topology: tpu7x:2x2x1
jax: 0.10.0
libtpu: 0.0.40
codegen_flags: <defaults>
</compile_context>

<pallas_src>
import math

import jax
import jax.numpy as jnp
import numpy as np
from jax.experimental import pallas as pl
from jax.experimental.pallas import tpu as pltpu


def _round_up(a, b):
    return (a + b - 1) // b * b


def _choose_tile_m(B, cap=256):
    """Pick TM (multiple of 16, <= cap) minimizing row padding; prefer >=2 grid steps."""
    candidates = [t for t in (256, 128, 64, 32, 16) if t <= cap]
    best = None
    for tm in candidates:
        bp = _round_up(B, tm)
        # score: (padding, penalize single-step grids, prefer larger tiles)
        key = (bp - B, 0 if bp // tm >= 2 else 1, -tm)
        if best is None or key < best[0]:
            best = (key, tm, bp)
    return best[1], best[2]


def _make_kernel(n_real, ne_p):
    """Kernel factory; n_real / ne_p are static so the mask is only emitted if needed."""
    needs_mask = ne_p != n_real

    def kernel(x_ref, kt_ref, v_ref, o_ref):
        # logits = x @ (scale * keys).T  -- temperature already folded into kt.
        # bf16 operands, f32 accumulation on the MXU.
        logits = jnp.dot(x_ref[...], kt_ref[...], preferred_element_type=jnp.float32)

        if needs_mask:
            # Padded dictionary entries must not contribute to the softmax denominator.
            col = jax.lax.broadcasted_iota(jnp.int32, logits.shape, dimension=1)
            logits = jnp.where(col < n_real, logits, jnp.float32(-1e30))

        # Numerically stable softmax; normalization deferred past the second matmul.
        m = jnp.max(logits, axis=-1, keepdims=True)
        p = jnp.exp(logits - m)                                # f32 EUP exp (v5e-safe)
        denom = jnp.sum(p, axis=-1, keepdims=True)             # (TM, 1)

        # Second matmul with unnormalized bf16 weights; normalize the (TM, Dv_p) result.
        acc = jnp.dot(p.astype(jnp.bfloat16), v_ref[...],
                      preferred_element_type=jnp.float32)
        o_ref[...] = (acc * pl.reciprocal(denom, approx=True)).astype(o_ref.dtype)

    return kernel


def prepare_soft_dictionary(keys, values, scaling_factor):
    """One-time preparation of the module constants.

    Folds the softmax temperature into keys, transposes, zero-pads to lane-dense
    shapes (multiples of 128) and casts to bf16. Call once per module, not per forward.
    """
    n_elements, d_k = keys.shape
    n2, d_v = values.shape
    assert n2 == n_elements

    dk_p = _round_up(d_k, 128)
    dv_p = _round_up(d_v, 128)
    ne_p = _round_up(n_elements, 128)

    kt = jnp.zeros((dk_p, ne_p), jnp.float32)
    kt = kt.at[:d_k, :n_elements].set(
        jnp.transpose(keys.astype(jnp.float32)) * jnp.float32(scaling_factor))
    vv = jnp.zeros((ne_p, dv_p), jnp.float32)
    vv = vv.at[:n_elements, :d_v].set(values.astype(jnp.float32))

    dims = dict(n_elements=n_elements, d_k=d_k, d_v=d_v,
                ne_p=ne_p, dk_p=dk_p, dv_p=dv_p)
    return kt.astype(jnp.bfloat16), vv.astype(jnp.bfloat16), dims


def soft_dictionary_forward(x, kt_p, v_p, dims, *, tile_m_cap=256):
    """x: (B, d_k) -> (B, d_v), using the pre-prepared padded bf16 dictionary."""
    B = x.shape[0]
    n_elements, d_k, d_v = dims["n_elements"], dims["d_k"], dims["d_v"]
    ne_p, dk_p, dv_p = dims["ne_p"], dims["dk_p"], dims["dv_p"]
    assert x.shape == (B, d_k)

    TM, Bp = _choose_tile_m(B, cap=tile_m_cap)

    # Per-call padding of x only (the dictionary never moves again). Zero-padded key
    # rows (>= d_k) make the extra x columns inert; padded batch rows are sliced off.
    if (Bp, dk_p) == (B, d_k) and x.dtype == jnp.bfloat16:
        x_p = x
    else:
        x_p = jnp.zeros((Bp, dk_p), jnp.bfloat16).at[:B, :d_k].set(
            x.astype(jnp.bfloat16))

    grid = (Bp // TM,)
    flops = 2 * Bp * dk_p * ne_p + 2 * Bp * ne_p * dv_p
    bytes_accessed = 2 * (Bp * dk_p + dk_p * ne_p + ne_p * dv_p) + 4 * Bp * dv_p

    out_p = pl.pallas_call(
        _make_kernel(n_elements, ne_p),
        out_shape=jax.ShapeDtypeStruct((Bp, dv_p), jnp.float32),
        grid_spec=pltpu.PrefetchScalarGridSpec(
            num_scalar_prefetch=0,
            grid=grid,
            in_specs=[
                # x tile: pipelined (double-buffered) over the row grid.
                pl.BlockSpec((TM, dk_p), lambda i: (i, 0)),
                # keys.T and values: constant index -> keep a single resident buffer.
                pl.BlockSpec((dk_p, ne_p), lambda i: (0, 0),
                             pipeline_mode=pl.Buffered(1)),
                pl.BlockSpec((ne_p, dv_p), lambda i: (0, 0),
                             pipeline_mode=pl.Buffered(1)),
            ],
            out_specs=pl.BlockSpec((TM, dv_p), lambda i: (i, 0)),
        ),
        compiler_params=pltpu.CompilerParams(
            dimension_semantics=("parallel",),   # rows independent -> megacore-shardable
            vmem_limit_bytes=48 * 1024 * 1024,   # explicit: v5e default scoped is 16 MiB
        ),
        cost_estimate=pl.CostEstimate(
            flops=flops,
            transcendentals=Bp * ne_p + Bp,      # exp + approx reciprocal
            bytes_accessed=bytes_accessed,
        ),
    )(x_p, kt_p, v_p)

    # Drop the row / channel padding.
    return out_p[:B, :d_v]


def reference_soft_dictionary(x, keys, values, scaling_factor):
    """Pure-JAX f32 reference matching the PyTorch forward."""
    logits = jnp.matmul(x.astype(jnp.float32), jnp.transpose(keys).astype(jnp.float32))
    weights = jax.nn.softmax(logits * jnp.float32(scaling_factor), axis=1)
    return jnp.matmul(weights, values.astype(jnp.float32))


if __name__ == "__main__":
    # SoftDictionary(d_v=32, d_k=32, n_elements=64), batch=8
    d_v, d_k, n_elements = 32, 32, 64
    B = 8

    key = jax.random.PRNGKey(0)
    kx, kk, kv = jax.random.split(key, 3)
    x = jax.random.normal(kx, (B, d_k), dtype=jnp.float32)
    keys = jax.random.normal(kk, (n_elements, d_k), dtype=jnp.float32)     # ~ N(0,1)
    values = jax.random.normal(kv, (n_elements, d_v), dtype=jnp.float32)   # ~ N(0,1)
    scaling_factor = 1.0 / math.sqrt(d_k)  # non-trainable parameter of the module

    # One-time parameter preparation (would live in module __init__ / param conversion).
    kt_p, v_p, dims = prepare_soft_dictionary(keys, values, scaling_factor)

    out = soft_dictionary_forward(x, kt_p, v_p, dims)
    out = jax.block_until_ready(out)

    # bf16 matmul operands => compare against the f32 reference with a bf16-appropriate
    # tolerance (accumulation is f32, so errors stay at the operand-rounding level).
    ref = reference_soft_dictionary(x, keys, values, scaling_factor)
    np.testing.assert_allclose(np.asarray(out), np.asarray(ref), atol=3e-2, rtol=3e-2)

    print("KERNEL_OK")
</pallas_src>

<mosaic_0001>
module attributes {stable_mosaic.version = 11 : i64} {
  func.func @kernel(%arg0: i32, %arg1: memref<16x128xbf16, #tpu.memory_space<vmem>>, %arg2: memref<128x128xbf16, #tpu.memory_space<vmem>>, %arg3: memref<128x128xbf16, #tpu.memory_space<vmem>>, %arg4: memref<16x128xf32, #tpu.memory_space<vmem>>) attributes {dimension_semantics = [#tpu.dimension_semantics<parallel>], iteration_bounds = array<i64: 1>, scalar_prefetch = 0 : i64, scratch_operands = 0 : i64, tpu.core_type = #tpu.core_type<tc>, window_params = [{transform_indices = @transform_0, window_bounds = array<i64: 16, 128>}, {pipeline_mode = #tpu.pipeline_mode<synchronous>, transform_indices = @transform_1, window_bounds = array<i64: 128, 128>}, {pipeline_mode = #tpu.pipeline_mode<synchronous>, transform_indices = @transform_2, window_bounds = array<i64: 128, 128>}, {transform_indices = @transform_3, window_bounds = array<i64: 16, 128>}]} {
    %c0 = arith.constant 0 : index
    %c0_0 = arith.constant 0 : index
    %0 = vector.load %arg1[%c0, %c0_0] : memref<16x128xbf16, #tpu.memory_space<vmem>>, vector<16x128xbf16>
    %c0_1 = arith.constant 0 : index
    %c0_2 = arith.constant 0 : index
    %1 = vector.load %arg2[%c0_1, %c0_2] : memref<128x128xbf16, #tpu.memory_space<vmem>>, vector<128x128xbf16>
    %cst = arith.constant dense<0.000000e+00> : vector<16x128xf32>
    %2 = tpu.matmul %0, %1, %cst {dimension_numbers = #tpu.dot_dimension_numbers<[1], [0], [0], [1], [0, 0, 1, 1], [], []>} : vector<16x128xbf16>, vector<128x128xbf16>, vector<16x128xf32> -> vector<16x128xf32>
    %3 = tpu.iota {dimensions = array<i32: 1>} : vector<16x128xi32>
    %c64_i32 = arith.constant 64 : i32
    %4 = vector.broadcast %c64_i32 : i32 to vector<16x128xi32>
    %5 = arith.cmpi slt, %3, %4 : vector<16x128xi32>
    %cst_3 = arith.constant -1.000000e+30 : f32
    %6 = vector.broadcast %cst_3 : f32 to vector<16x128xf32>
    %7 = arith.select %5, %2, %6 : vector<16x128xi1>, vector<16x128xf32>
    %cst_4 = arith.constant dense<0xFF800000> : vector<16xf32>
    %8 = vector.multi_reduction <maximumf>, %7, %cst_4 [1] : vector<16x128xf32> to vector<16xf32>
    %9 = vector.shape_cast %8 : vector<16xf32> to vector<16x1xf32>
    %10 = vector.broadcast %9 : vector<16x1xf32> to vector<16x128xf32>
    %11 = arith.subf %7, %10 : vector<16x128xf32>
    %12 = math.exp %11 : vector<16x128xf32>
    %cst_5 = arith.constant dense<0.000000e+00> : vector<16xf32>
    %13 = vector.multi_reduction <add>, %12, %cst_5 [1] : vector<16x128xf32> to vector<16xf32>
    %14 = vector.shape_cast %13 : vector<16xf32> to vector<16x1xf32>
    %15 = arith.truncf %12 : vector<16x128xf32> to vector<16x128xbf16>
    %c0_6 = arith.constant 0 : index
    %c0_7 = arith.constant 0 : index
    %16 = vector.load %arg3[%c0_6, %c0_7] : memref<128x128xbf16, #tpu.memory_space<vmem>>, vector<128x128xbf16>
    %cst_8 = arith.constant dense<0.000000e+00> : vector<16x128xf32>
    %17 = tpu.matmul %15, %16, %cst_8 {dimension_numbers = #tpu.dot_dimension_numbers<[1], [0], [0], [1], [0, 0, 1, 1], [], []>} : vector<16x128xbf16>, vector<128x128xbf16>, vector<16x128xf32> -> vector<16x128xf32>
    %18 = tpu.reciprocal %14 {approx = true} : vector<16x1xf32> -> vector<16x1xf32>
    %19 = vector.broadcast %18 : vector<16x1xf32> to vector<16x128xf32>
    %20 = arith.mulf %17, %19 : vector<16x128xf32>
    %c0_9 = arith.constant 0 : index
    %c0_10 = arith.constant 0 : index
    %21 = vector.load %arg4[%c0_9, %c0_10] : memref<16x128xf32, #tpu.memory_space<vmem>>, vector<16x128xf32>
    tpu.vector_store %arg4[%c0_9, %c0_10], %20 {strides = array<i32>} : memref<16x128xf32, #tpu.memory_space<vmem>>, vector<16x128xf32>,
    return
  }
  func.func @transform_0(%arg0: i32) -> (i32, i32) {
    %c0_i32 = arith.constant 0 : i32
    %c0_i32_0 = arith.constant 0 : i32
    return %arg0, %c0_i32 : i32, i32
  }
  func.func @transform_1(%arg0: i32) -> (i32, i32) {
    %c0_i32 = arith.constant 0 : i32
    %c0_i32_0 = arith.constant 0 : i32
    %c0_i32_1 = arith.constant 0 : i32
    return %c0_i32, %c0_i32_0 : i32, i32
  }
  func.func @transform_2(%arg0: i32) -> (i32, i32) {
    %c0_i32 = arith.constant 0 : i32
    %c0_i32_0 = arith.constant 0 : i32
    %c0_i32_1 = arith.constant 0 : i32
    return %c0_i32, %c0_i32_0 : i32, i32
  }
  func.func @transform_3(%arg0: i32) -> (i32, i32) {
    %c0_i32 = arith.constant 0 : i32
    %c0_i32_0 = arith.constant 0 : i32
    return %arg0, %c0_i32 : i32, i32
  }
}

</mosaic_0001>

<bundles_post_ra>
// kernel: tpu_custom_call.1
= control target key start
LH: loop header
LB: loop body
LE: loop exit
PB: predicated region body
PF: predicated region fallthrough
CT: control target
= control target key end

     0   :  { %8 = vsyncpa [#allocation3], 0  ;;  %s617_s0 = inlined_call_operand.hbm [shape: bf16[16,128], index: 0, kind: input, shape index: {}]   ;;  %s618_s1 = inlined_call_operand.hbm [shape: bf16[128,128], index: 1, kind: input, shape index: {}]   ;;  %s619_s2 = inlined_call_operand.hbm [shape: bf16[128,128], index: 2, kind: input, shape index: {}]   ;;  %s620_s3 = inlined_call_operand.hbm [shape: f32[16,128], index: 3, kind: output, shape index: {}]  }
   0x1   :  { %9 = vsyncpa [#allocation6], 0 }
   0x2   :  { %10 = vsyncpa [#allocation4], 0  ;;  %s523_s12 = smov [#allocation5]   ;;  %s524_s14 = smov [#allocation2]  }
   0x3   :  { %s28_s13 = sshll.u32 %s523_s12, 4  ;;  %s16_s15 = sshll.u32 %s524_s14, 4  ;;  %s29_s13 = int_to_ptr.vmem [resolvable:$true] %s28_s13  ;;  %s553_s15 = int_to_ptr.vmem [resolvable:$true] %s16_s15 }
   0x4   :  { %s429_s18 = scalar_lea.hbm %s618_s1, 1024 }
   0x5   :  { %p430_p0 = scmp.ne.s32.totalorder %s618_s1, %s429_s18  ;;  %p433_p1 = scmp.lt.u32.totalorder %s429_s18, %s618_s1 }
   0x7   :  { %p435_p2 = pnand %p433_p1, %p430_p0 }
   0x9   :  { %438 = shalt.err (!%p435_p2)
}
   0xa   :  { %s439_s23 = scalar_lea.vmem %s29_s13, 1024  ;;  %p444_p4 = scmp.lt.s32.totalorder %s29_s13, %s29_s13 }
   0xb   :  { %p440_p3 = scmp.ne.s32.totalorder %s29_s13, %s439_s23  ;;  %p445_p5 = scmp.lt.s32.totalorder %s439_s23, %s439_s23 }
   0xd   :  { %p446_p6 = por %p445_p5, %p444_p4 }
   0xf   :  { %p447_p7 = pnand %p446_p6, %p440_p3 }
  0x11   :  { %450 = shalt.err (!%p447_p7)
}
  0x12   :  { %s525_s24 = smov 64   ;;  %s526_s25 = smov 4  }
  0x13   :  { %34 = dma.hbm_to_vmem [thread:$0]  %s618_s1, 1024, %s29_s13, [#allocation6], %s525_s24, %s525_s24, %s526_s25  }
  0x14   :  { %s451_s30 = scalar_lea.hbm %s617_s0, 128 }
  0x15   :  { %p452_p8 = scmp.ne.s32.totalorder %s617_s0, %s451_s30  ;;  %p455_p9 = scmp.lt.u32.totalorder %s451_s30, %s617_s0 }
  0x17   :  { %p457_p10 = pnand %p455_p9, %p452_p8 }
  0x19   :  { %460 = shalt.err (!%p457_p10)
}
  0x1a   :  { %s461_s8 = scalar_lea.vmem %s553_s15, 128  ;;  %p466_p12 = scmp.lt.s32.totalorder %s553_s15, %s553_s15 }
  0x1b   :  { %p462_p11 = scmp.ne.s32.totalorder %s553_s15, %s461_s8  ;;  %p467_p13 = scmp.lt.s32.totalorder %s461_s8, %s461_s8 }
  0x1d   :  { %p468_p0 = por %p467_p13, %p466_p12 }
  0x1f   :  { %p469_p1 = pnand %p468_p0, %p462_p11 }
  0x21   :  { %472 = shalt.err (!%p469_p1)
}
  0x22   :  { %22 = dma.hbm_to_vmem [thread:$0]  %s617_s0, 128, %s553_s15, [#allocation3], %s525_s24, %s525_s24, %s526_s25  }
  0x23   :  { %s527_s10 = smov [#allocation7]   ;;  %s473_s14 = scalar_lea.hbm %s619_s2, 1024 }
  0x24   :  { %s40_s11 = sshll.u32 %s527_s10, 4  ;;  %p474_p2 = scmp.ne.s32.totalorder %s619_s2, %s473_s14  ;;  %s41_s11 = int_to_ptr.vmem [resolvable:$true] %s40_s11 }
  0x25   :  { %p477_p3 = scmp.lt.u32.totalorder %s473_s14, %s619_s2 }
  0x27   :  { %p479_p4 = pnand %p477_p3, %p474_p2 }
  0x29   :  { %482 = shalt.err (!%p479_p4)
}
  0x2a   :  { %s483_s20 = scalar_lea.vmem %s41_s11, 1024  ;;  %p488_p6 = scmp.lt.s32.totalorder %s41_s11, %s41_s11 }
  0x2b   :  { %p484_p5 = scmp.ne.s32.totalorder %s41_s11, %s483_s20  ;;  %p489_p7 = scmp.lt.s32.totalorder %s483_s20, %s483_s20 }
  0x2d   :  { %p490_p8 = por %p489_p7, %p488_p6 }
  0x2f   :  { %p491_p9 = pnand %p490_p8, %p484_p5 }
  0x31   :  { %494 = shalt.err (!%p491_p9)
}
  0x32   :  { %46 = dma.hbm_to_vmem [thread:$0]  %s619_s2, 1024, %s41_s11, [#allocation6], %s525_s24, %s525_s24, %s526_s25  }
  0x33   :  { %517 = dma.done.wait [#allocation3], 128  }
  0x34   :  { %518 = vsyncadd [#allocation3], 4294967168 }
  0x35   :  { %519 = dma.done.wait [#allocation6], 2048  }
  0x36   :  { %520 = vsyncadd [#allocation6], 4294965248  ;;  %v528_v0 = vmov 0.0   ;;  %vm529_vm0 = vmmov 0   ;;  %v404_v1 = vld [vmem:[#allocation5] sm:$0xff]   ;;  %v405_v2 = vld [vmem:[#allocation5 + $0x8] sm:$0xff]   ;;  %v170_v13 = vlaneseq }
  0x37   :  { %354 = vmatprep.subr.bf16.mxu0 %v528_v0  ;;  %370 = vmatprep.mubr.msk.bf16.mxu0 %vm529_vm0, %v528_v0  ;;  %v406_v3 = vld [vmem:[#allocation5 + $0x10] sm:$0xff]   ;;  %v407_v4 = vld [vmem:[#allocation5 + $0x18] sm:$0xff]   ;;  %v408_v5 = vld [vmem:[#allocation5 + $0x20] sm:$0xff]   ;;  %s530_s2 = smov [#allocation8]  }
  0x38   :  { %374 = vmatprep.subr.bf16.mxu1 %v528_v0  ;;  %390 = vmatprep.mubr.msk.bf16.mxu1 %vm529_vm0, %v528_v0  ;;  %v409_v6 = vld [vmem:[#allocation5 + $0x28] sm:$0xff]   ;;  %v410_v7 = vld [vmem:[#allocation5 + $0x30] sm:$0xff]   ;;  %v411_v8 = vld [vmem:[#allocation5 + $0x38] sm:$0xff]   ;;  %v171_v14 = vand.u32 127, %v170_v13  ;;  %s306_s21 = sshll.u32 %s530_s2, 4  ;;  %s307_s21 = int_to_ptr.vmem [resolvable:$true] %s306_s21 }
  0x39   :  { %355 = vmatpush3.bf16.msra.mxu0 %v404_v1  ;;  %v412_v9 = vld [vmem:[#allocation2] sm:$0xff]   ;;  %v413_v10 = vld [vmem:[#allocation7] sm:$0xff]   ;;  %v414_v11 = vld [vmem:[#allocation7 + $0x8] sm:$0xff]   ;;  %s495_s22 = scalar_lea.vmem %s307_s21, 256  ;;  %p500_p11 = scmp.lt.s32.totalorder %s307_s21, %s307_s21 }
  0x3a   :  { %356 = vmatprep.subr.bf16.mxu0 %v528_v0  ;;  %375 = vmatpush3.bf16.msra.mxu1 %v413_v10  ;;  %v415_v12 = vld [vmem:[#allocation7 + $0x10] sm:$0xff]   ;;  %vm172_vm1 = vcmp.lt.s32.totalorder %v171_v14, 64  ;;  %v416_v21 = vld [vmem:[#allocation7 + $0x18] sm:$0xff]   ;;  %v417_v22 = vld [vmem:[#allocation7 + $0x20] sm:$0xff]   ;;  %p496_p10 = scmp.ne.s32.totalorder %s307_s21, %s495_s22  ;;  %p501_p12 = scmp.lt.s32.totalorder %s495_s22, %s495_s22 }
  0x3b   :  { %376 = vmatprep.subr.bf16.mxu1 %v528_v0  ;;  %v418_v23 = vld [vmem:[#allocation7 + $0x28] sm:$0xff]   ;;  %v419_v24 = vld [vmem:[#allocation7 + $0x30] sm:$0xff]   ;;  %v420_v25 = vld [vmem:[#allocation7 + $0x38] sm:$0xff]  }
  0x3c   :  { %p502_p13 = por %p501_p12, %p500_p11 }
  0x3d   :  { %357 = vmatpush3.bf16.msra.mxu0 %v405_v2 }
  0x3e   :  { %358 = vmatprep.subr.bf16.mxu0 %v528_v0  ;;  %377 = vmatpush3.bf16.msra.mxu1 %v414_v11  ;;  %p503_p0 = pnand %p502_p13, %p496_p10 }
  0x3f   :  { %378 = vmatprep.subr.bf16.mxu1 %v528_v0 }
  0x41   :  { %359 = vmatpush3.bf16.msra.mxu0 %v406_v3 }
  0x42   :  { %360 = vmatprep.subr.bf16.mxu0 %v528_v0  ;;  %379 = vmatpush3.bf16.msra.mxu1 %v415_v12 }
  0x43   :  { %380 = vmatprep.subr.bf16.mxu1 %v528_v0 }
  0x45   :  { %361 = vmatpush3.bf16.msra.mxu0 %v407_v4 }
  0x46   :  { %362 = vmatprep.subr.bf16.mxu0 %v528_v0  ;;  %381 = vmatpush3.bf16.msra.mxu1 %v416_v21 }
  0x47   :  { %382 = vmatprep.subr.bf16.mxu1 %v528_v0 }
  0x49   :  { %363 = vmatpush3.bf16.msra.mxu0 %v408_v5 }
  0x4a   :  { %364 = vmatprep.subr.bf16.mxu0 %v528_v0  ;;  %383 = vmatpush3.bf16.msra.mxu1 %v417_v22 }
  0x4b   :  { %384 = vmatprep.subr.bf16.mxu1 %v528_v0 }
  0x4d   :  { %365 = vmatpush3.bf16.msra.mxu0 %v409_v6 }
  0x4e   :  { %366 = vmatprep.subr.bf16.mxu0 %v528_v0  ;;  %385 = vmatpush3.bf16.msra.mxu1 %v418_v23 }
  0x4f   :  { %386 = vmatprep.subr.bf16.mxu1 %v528_v0 }
  0x51   :  { %367 = vmatpush3.bf16.msra.mxu0 %v410_v7 }
  0x52   :  { %368 = vmatprep.subr.bf16.mxu0 %v528_v0  ;;  %387 = vmatpush3.bf16.msra.mxu1 %v419_v24 }
  0x53   :  { %388 = vmatprep.subr.bf16.mxu1 %v528_v0 }
  0x55   :  { %369 = vmatpush3.bf16.msra.mxu0 %v411_v8 }
  0x56   :  { %389 = vmatpush3.bf16.msra.mxu1 %v420_v25 }
  0x58   :  { %371 = vmatmul.mubr.bf16.vlgmr.msra.gmra.mrb[0].mxu0 %v412_v9 }
 0x12b   :  { %v163_v15 = vpop.f32.mrb[0].mxu0 }
 0x12c   :  { %v372_v16 = vpop.f32.mrb[1].mxu0  ;;  %v173_v17 = vsel %vm172_vm1, %v163_v15, -1e+30 }
 0x12d   :  { %175 = vmax.xlane.f32.xlu0 %v173_v17  ;;  %v166_v18 = vpop.f32.mrb[2].mxu0 }
 0x12e   :  { %v373_v19 = vpop.f32.mrb[3].mxu0  ;;  %v174_v20 = vsel %vm172_vm1, %v166_v18, -1e+30 }
 0x131   :  { %177 = vmax.xlane.f32.xlu0 %v174_v20 }
 0x1ba   :  { %v176_v26 = vpop.xlane.xlu0 %175 }
 0x1bb   :  { %v179_v27 = vsub.f32 %v173_v17, %v176_v26 }
 0x1bd   :  { %v181_v28 = vmul.f32 1.442695, %v179_v27 }
 0x1be   :  { %v178_v29 = vpop.xlane.xlu0 %177 }
 0x1bf   :  { %421 = vpow2.f32 %v181_v28  ;;  %v180_v30 = vsub.f32 %v174_v20, %v178_v29 }
 0x1c1   :  { %v183_v31 = vmul.f32 1.442695, %v180_v30 }
 0x1c3   :  { %423 = vpow2.f32 %v183_v31 }
 0x1c9   :  { %v422_v32 = vpop.eup %421 }
 0x1ca   :  { %185 = vadd.xlane.f32.xlu1 %v422_v32 }
 0x1cd   :  { %v424_v33 = vpop.eup %423 }
 0x1ce   :  { %187 = vadd.xlane.f32.xlu1 %v424_v33  ;;  %v189_v34 = vpack.c.bf16 %v424_v33, %v422_v32 }
 0x1d0   :  { %391 = vmatmul.mubr.bf16.vlgmr.msra.gmra.mrb[0].mxu1 %v189_v34 }
 0x257   :  { %v186_v35 = vpop.xlane.xlu1 %185 }
 0x258   :  { %425 = vrcp.f32 %v186_v35 }
 0x25b   :  { %v188_v36 = vpop.xlane.xlu1 %187 }
 0x25c   :  { %427 = vrcp.f32 %v188_v36 }
 0x262   :  { %v426_v37 = vpop.eup %425 }
 0x266   :  { %v428_v41 = vpop.eup %427 }
 0x2a3   :  { %v288_v38 = vpop.f32.mrb[0].mxu1 }
 0x2a4   :  { %v297_v39 = vmul.f32 %v426_v37, %v288_v38  ;;  %v392_v40 = vpop.f32.mrb[1].mxu1 }
 0x2a5   :  { %v291_v42 = vpop.f32.mrb[2].mxu1 }
 0x2a6   :  { %299 = vst [vmem:[#allocation8] sm:$0xff] %v297_v39  ;;  %v298_v43 = vmul.f32 %v428_v41, %v291_v42  ;;  %v393_v44 = vpop.f32.mrb[3].mxu1 }
 0x2a8   :  { %300 = vst [vmem:[#allocation8 + $0x8] sm:$0xff] %v298_v43 }
 0x2a9   :  { %506 = shalt.err (!%p503_p0)
}
 0x2aa   :  { %s507_s25 = scalar_lea.hbm %s620_s3, 256 }
 0x2ab   :  { %p508_p1 = scmp.ne.s32.totalorder %s620_s3, %s507_s25  ;;  %p511_p2 = scmp.lt.u32.totalorder %s507_s25, %s620_s3 }
 0x2ad   :  { %p513_p3 = pnand %p511_p2, %p508_p1 }
 0x2af   :  { %516 = shalt.err (!%p513_p3)
}
 0x2b0   :  { %s531_s30 = smov 128   ;;  %s532_s4 = smov 8  }
 0x2b1   :  { %312 = dma.vmem_to_hbm [thread:$0]  %s307_s21, 256, %s620_s3, [#allocation4], %s531_s30, %s531_s30, %s532_s4  }
 0x2b2   :  { %521 = dma.done.wait [#allocation4], 256  }
 0x2b3   :  { %522 = vsyncadd [#allocation4], 4294967040 }
 0x2b4   :  { %316 = vsyncpa [#allocation3], 1 }
 0x2b5   :  { %317 = vsyncpa [#allocation6], 1 }
 0x2b6   :  { %318 = vsyncpa [#allocation4], 1 }

</bundles_post_ra>
